<compile_context>
chip_gen: v7x
topology: tpu7x:2x2x1
jax: 0.10.0
libtpu: 0.0.40
codegen_flags: <defaults>
</compile_context>

<pallas_src>
import functools

import jax
import jax.numpy as jnp
from jax import lax
from jax.experimental import pallas as pl
from jax.experimental.pallas import tpu as pltpu


def _l1block_kernel(x_ref, w1_ref, b1_ref, w2_ref, b2_ref, o_ref, *,
                    shift, rows_per_sample):
    # x_ref/o_ref : [M, C2] f32   (M = block_n * H * W/P rows, C2 = P*64 lanes)
    # w*_ref      : [C2, 3*C2]    block-diagonal per-tap weights, BN scale folded
    # b*_ref      : [1, C2]       BN bias + folded conv bias (tiled over packs)
    M, C2 = x_ref.shape
    cdt = w1_ref.dtype                       # matmul compute dtype (bf16 or f32)

    # Per-sample H-boundary masks; they also nullify cross-sample wrap of rolls.
    rh = lax.broadcasted_iota(jnp.int32, (M, C2), 0)
    if M != rows_per_sample:
        rh = rh % rows_per_sample
    m_lo = rh >= shift                          # h >= 1   -> tap (h-1) valid
    m_hi = rh < (rows_per_sample - shift)       # h <= H-2 -> tap (h+1) valid

    xf = x_ref[...]                             # keep f32 for the residual
    zero = jnp.float32(0.0)

    def conv3h(xin, w_ref):
        # One MXU matmul for all 3 taps and all samples in the block:
        #   [M, C2] @ [C2, 3*C2] -> [M, 3*C2], f32 accumulate.
        y = jnp.dot(xin, w_ref[...], preferred_element_type=jnp.float32)
        acc = y[:, C2:2 * C2]                                         # center tap
        t0 = pltpu.roll(y[:, 0:C2], shift=shift, axis=0)              # x[h-1] tap
        acc = acc + jnp.where(m_lo, t0, zero)
        t2 = pltpu.roll(y[:, 2 * C2:3 * C2], shift=M - shift, axis=0)  # x[h+1] tap
        acc = acc + jnp.where(m_hi, t2, zero)
        return acc

    h1 = jnp.maximum(conv3h(xf.astype(cdt), w1_ref) + b1_ref[...], 0.0)  # bn1+relu
    h2 = conv3h(h1.astype(cdt), w2_ref)
    o_ref[...] = jnp.maximum(h2 + b2_ref[...] + xf, 0.0).astype(o_ref.dtype)


def _vmem_capacity_bytes():
    try:
        info = pltpu.get_tpu_info()
        cap = getattr(info, "vmem_capacity_bytes", None)
        if cap:
            return int(cap)
    except Exception:
        pass
    return 64 * 1024 * 1024      # conservative (v7x per-core VMEM)


@functools.partial(jax.jit, static_argnames=("use_bf16", "block_n"))
def l1block_pallas(x_nchw, w1_t, cb1, g1, be1, m1, v1,
                   w2_t, cb2, g2, be2, m2, v2,
                   eps=1e-5, *, use_bf16=True, block_n=None):
    """L1Block forward. x_nchw: [N, 64, H, W] float32 (PyTorch NCHW). Returns NCHW."""
    N, C, H, W = x_nchw.shape
    assert C == 64, "L1Block requires 64 channels"

    P = 2 if W % 2 == 0 else 1        # lane-pack factor: 2 W-columns -> 128 lanes
    C2 = P * C
    W2 = W // P
    rows = H * W2                     # rows per sample
    shift = W2                        # sublane shift for one H step

    cdt = jnp.bfloat16 if use_bf16 else jnp.float32

    # ---- fold eval-mode BN scale + conv bias outside the kernel --------------
    inv1 = g1 * lax.rsqrt(v1 + eps)
    inv2 = g2 * lax.rsqrt(v2 + eps)
    b1 = jnp.tile((be1 + (cb1 - m1) * inv1).reshape(1, C), (1, P))
    b2 = jnp.tile((be2 + (cb2 - m2) * inv2).reshape(1, C), (1, P))

    eye_p = jnp.eye(P, dtype=jnp.float32)

    def prep_w(w_t, inv):
        # torch [Cout, Cin, 3, 1] -> [3, Cin, Cout], BN scale folded along Cout.
        w = jnp.transpose(w_t[:, :, :, 0], (2, 1, 0)) * inv[None, None, :]
        # Block-diagonal lane packing; tap t occupies 128-aligned columns
        # [t*C2:(t+1)*C2] with the same pack layout as the activations.
        taps = [jnp.kron(eye_p, w[t]) for t in range(3)]     # each [C2, C2]
        return jnp.concatenate(taps, axis=1).astype(cdt)     # [C2, 3*C2]

    w1cat = prep_w(w1_t, inv1)
    w2cat = prep_w(w2_t, inv2)

    # NCHW -> lane-dense rows: [N*H*W2, P*C]; channels (x P W-columns) on lanes,
    # each H step = W2 consecutive sublanes.
    x_flat = jnp.transpose(x_nchw, (0, 2, 3, 1)).reshape(N * rows, C2)

    # ---- samples per grid step (generation-aware VMEM budget) -----------------
    phys = _vmem_capacity_bytes()
    if block_n is None:
        # x/out double-buffered + two f32 [rows, 3*C2] matmul results + temps.
        per_sample = H * W * C * 4 * 14
        budget = max(phys // 4, 4 << 20)     # ~16 MiB on v7x, ~32 MiB on v5e/v6e
        cap = max(1, budget // per_sample)
        divs = [d for d in range(1, N + 1) if N % d == 0 and d <= cap]
        two_step = [d for d in divs if N // d >= 2]   # keep both v7x TCs busy
        block_n = max(two_step) if two_step else max(divs)
    if rows % 8 != 0:
        block_n = N                           # block must then equal full rows
    assert N % block_n == 0
    grid = (N // block_n,)

    kernel = functools.partial(_l1block_kernel, shift=shift, rows_per_sample=rows)
    out_flat = pl.pallas_call(
        kernel,
        out_shape=jax.ShapeDtypeStruct((N * rows, C2), jnp.float32),
        grid_spec=pltpu.PrefetchScalarGridSpec(
            num_scalar_prefetch=0,
            grid=grid,
            in_specs=[
                pl.BlockSpec((block_n * rows, C2), lambda n: (n, 0)),
                pl.BlockSpec((C2, 3 * C2), lambda n: (0, 0)),
                pl.BlockSpec((1, C2), lambda n: (0, 0)),
                pl.BlockSpec((C2, 3 * C2), lambda n: (0, 0)),
                pl.BlockSpec((1, C2), lambda n: (0, 0)),
            ],
            out_specs=pl.BlockSpec((block_n * rows, C2), lambda n: (n, 0)),
        ),
        compiler_params=pltpu.CompilerParams(
            dimension_semantics=("parallel",),
            vmem_limit_bytes=int(min(phys // 2, 96 << 20)),
        ),
    )(x_flat, w1cat, b1, w2cat, b2)

    return jnp.transpose(out_flat.reshape(N, H, W, C), (0, 3, 1, 2))


def _ref_forward(x, w1, cb1, g1, be1, m1, v1, w2, cb2, g2, be2, m2, v2, eps=1e-5):
    """Pure-JAX reference (NCHW, torch-layout conv weights [O,I,3,1], eval-mode BN)."""
    def conv(y, w, cb):
        out = lax.conv_general_dilated(
            y, w, window_strides=(1, 1), padding=((1, 1), (0, 0)),
            dimension_numbers=("NCHW", "OIHW", "NCHW"))
        return out + cb[None, :, None, None]

    def bn(y, g, be, m, v):
        inv = g / jnp.sqrt(v + eps)
        return y * inv[None, :, None, None] + (be - m * inv)[None, :, None, None]

    h = jnp.maximum(bn(conv(x, w1, cb1), g1, be1, m1, v1), 0.0)
    h = bn(conv(h, w2, cb2), g2, be2, m2, v2)
    return jnp.maximum(h + x, 0.0)


if __name__ == "__main__":
    key = jax.random.PRNGKey(0)
    keys = jax.random.split(key, 16)

    N, C, H, W = 2, 64, 16, 8          # conv1 requires 64 input channels
    x = jax.random.normal(keys[0], (N, C, H, W), dtype=jnp.float32)

    fan_in = C * 3 * 1
    bound = 1.0 / (fan_in ** 0.5)
    w1 = jax.random.uniform(keys[1], (C, C, 3, 1), jnp.float32, -bound, bound)
    cb1 = jax.random.uniform(keys[2], (C,), jnp.float32, -bound, bound)
    w2 = jax.random.uniform(keys[3], (C, C, 3, 1), jnp.float32, -bound, bound)
    cb2 = jax.random.uniform(keys[4], (C,), jnp.float32, -bound, bound)
    g1 = 1.0 + 0.1 * jax.random.normal(keys[5], (C,), jnp.float32)
    be1 = 0.1 * jax.random.normal(keys[6], (C,), jnp.float32)
    m1 = 0.1 * jax.random.normal(keys[7], (C,), jnp.float32)
    v1 = jnp.abs(jax.random.normal(keys[8], (C,), jnp.float32)) + 0.5
    g2 = 1.0 + 0.1 * jax.random.normal(keys[9], (C,), jnp.float32)
    be2 = 0.1 * jax.random.normal(keys[10], (C,), jnp.float32)
    m2 = 0.1 * jax.random.normal(keys[11], (C,), jnp.float32)
    v2 = jnp.abs(jax.random.normal(keys[12], (C,), jnp.float32)) + 0.5

    ref = _ref_forward(x, w1, cb1, g1, be1, m1, v1, w2, cb2, g2, be2, m2, v2)
    ref_scale = float(jnp.max(jnp.abs(ref))) + 1e-6

    # Exact f32 path: tight numerical check.
    out_f32 = jax.block_until_ready(
        l1block_pallas(x, w1, cb1, g1, be1, m1, v1, w2, cb2, g2, be2, m2, v2,
                       use_bf16=False))
    assert out_f32.shape == (N, C, H, W)
    err_f32 = float(jnp.max(jnp.abs(out_f32 - ref)))
    assert err_f32 < 2e-4, err_f32

    # Default bf16-MXU path (f32 accumulate): relative-error check.
    out_bf16 = jax.block_until_ready(
        l1block_pallas(x, w1, cb1, g1, be1, m1, v1, w2, cb2, g2, be2, m2, v2))
    rel_bf16 = float(jnp.max(jnp.abs(out_bf16 - ref))) / ref_scale
    assert rel_bf16 < 3e-2, rel_bf16

    print("KERNEL_OK")
</pallas_src>

<mosaic_0001>
module attributes {stable_mosaic.version = 11 : i64} {
  func.func @_l1block_kernel(%arg0: i32, %arg1: memref<64x128xf32, #tpu.memory_space<vmem>>, %arg2: memref<128x384xf32, #tpu.memory_space<vmem>>, %arg3: memref<1x128xf32, #tpu.memory_space<vmem>>, %arg4: memref<128x384xf32, #tpu.memory_space<vmem>>, %arg5: memref<1x128xf32, #tpu.memory_space<vmem>>, %arg6: memref<64x128xf32, #tpu.memory_space<vmem>>) attributes {dimension_semantics = [#tpu.dimension_semantics<parallel>], iteration_bounds = array<i64: 2>, scalar_prefetch = 0 : i64, scratch_operands = 0 : i64, tpu.core_type = #tpu.core_type<tc>, window_params = [{transform_indices = @transform_0, window_bounds = array<i64: 64, 128>}, {pipeline_mode = #tpu.pipeline_mode<synchronous>, transform_indices = @transform_1, window_bounds = array<i64: 128, 384>}, {pipeline_mode = #tpu.pipeline_mode<synchronous>, transform_indices = @transform_2, window_bounds = array<i64: 1, 128>}, {pipeline_mode = #tpu.pipeline_mode<synchronous>, transform_indices = @transform_3, window_bounds = array<i64: 128, 384>}, {pipeline_mode = #tpu.pipeline_mode<synchronous>, transform_indices = @transform_4, window_bounds = array<i64: 1, 128>}, {transform_indices = @transform_5, window_bounds = array<i64: 64, 128>}]} {
    %0 = tpu.iota {dimensions = array<i32: 0>} : vector<64x128xi32>
    %c4_i32 = arith.constant 4 : i32
    %1 = vector.broadcast %c4_i32 : i32 to vector<64x128xi32>
    %2 = arith.cmpi sge, %0, %1 : vector<64x128xi32>
    %c60_i32 = arith.constant 60 : i32
    %3 = vector.broadcast %c60_i32 : i32 to vector<64x128xi32>
    %4 = arith.cmpi slt, %0, %3 : vector<64x128xi32>
    %c0 = arith.constant 0 : index
    %c0_0 = arith.constant 0 : index
    %5 = vector.load %arg1[%c0, %c0_0] : memref<64x128xf32, #tpu.memory_space<vmem>>, vector<64x128xf32>
    %c0_1 = arith.constant 0 : index
    %c0_2 = arith.constant 0 : index
    %6 = vector.load %arg2[%c0_1, %c0_2] : memref<128x384xf32, #tpu.memory_space<vmem>>, vector<128x384xf32>
    %cst = arith.constant dense<0.000000e+00> : vector<64x384xf32>
    %7 = tpu.matmul %5, %6, %cst {dimension_numbers = #tpu.dot_dimension_numbers<[1], [0], [0], [1], [0, 0, 1, 1], [], []>} : vector<64x128xf32>, vector<128x384xf32>, vector<64x384xf32> -> vector<64x384xf32>
    %8 = vector.extract_strided_slice %7 {offsets = [0, 128], sizes = [64, 128], strides = [1, 1]} : vector<64x384xf32> to vector<64x128xf32>
    %9 = vector.extract_strided_slice %7 {offsets = [0, 0], sizes = [64, 128], strides = [1, 1]} : vector<64x384xf32> to vector<64x128xf32>
    %c4_i32_3 = arith.constant 4 : i32
    %10 = tpu.dynamic_rotate %9 by %c4_i32_3 dim 0 : vector<64x128xf32>, i32 -> vector<64x128xf32>
    %cst_4 = arith.constant 0.000000e+00 : f32
    %11 = vector.broadcast %cst_4 : f32 to vector<64x128xf32>
    %12 = arith.select %2, %10, %11 : vector<64x128xi1>, vector<64x128xf32>
    %13 = arith.addf %8, %12 : vector<64x128xf32>
    %14 = vector.extract_strided_slice %7 {offsets = [0, 256], sizes = [64, 128], strides = [1, 1]} : vector<64x384xf32> to vector<64x128xf32>
    %c60_i32_5 = arith.constant 60 : i32
    %15 = tpu.dynamic_rotate %14 by %c60_i32_5 dim 0 : vector<64x128xf32>, i32 -> vector<64x128xf32>
    %cst_6 = arith.constant 0.000000e+00 : f32
    %16 = vector.broadcast %cst_6 : f32 to vector<64x128xf32>
    %17 = arith.select %4, %15, %16 : vector<64x128xi1>, vector<64x128xf32>
    %18 = arith.addf %13, %17 : vector<64x128xf32>
    %c0_7 = arith.constant 0 : index
    %c0_8 = arith.constant 0 : index
    %19 = vector.load %arg3[%c0_7, %c0_8] : memref<1x128xf32, #tpu.memory_space<vmem>>, vector<1x128xf32>
    %20 = vector.broadcast %19 : vector<1x128xf32> to vector<64x128xf32>
    %21 = arith.addf %18, %20 : vector<64x128xf32>
    %cst_9 = arith.constant 0.000000e+00 : f32
    %22 = vector.broadcast %cst_9 : f32 to vector<64x128xf32>
    %23 = arith.maximumf %21, %22 : vector<64x128xf32>
    %c0_10 = arith.constant 0 : index
    %c0_11 = arith.constant 0 : index
    %24 = vector.load %arg4[%c0_10, %c0_11] : memref<128x384xf32, #tpu.memory_space<vmem>>, vector<128x384xf32>
    %cst_12 = arith.constant dense<0.000000e+00> : vector<64x384xf32>
    %25 = tpu.matmul %23, %24, %cst_12 {dimension_numbers = #tpu.dot_dimension_numbers<[1], [0], [0], [1], [0, 0, 1, 1], [], []>} : vector<64x128xf32>, vector<128x384xf32>, vector<64x384xf32> -> vector<64x384xf32>
    %26 = vector.extract_strided_slice %25 {offsets = [0, 128], sizes = [64, 128], strides = [1, 1]} : vector<64x384xf32> to vector<64x128xf32>
    %27 = vector.extract_strided_slice %25 {offsets = [0, 0], sizes = [64, 128], strides = [1, 1]} : vector<64x384xf32> to vector<64x128xf32>
    %c4_i32_13 = arith.constant 4 : i32
    %28 = tpu.dynamic_rotate %27 by %c4_i32_13 dim 0 : vector<64x128xf32>, i32 -> vector<64x128xf32>
    %cst_14 = arith.constant 0.000000e+00 : f32
    %29 = vector.broadcast %cst_14 : f32 to vector<64x128xf32>
    %30 = arith.select %2, %28, %29 : vector<64x128xi1>, vector<64x128xf32>
    %31 = arith.addf %26, %30 : vector<64x128xf32>
    %32 = vector.extract_strided_slice %25 {offsets = [0, 256], sizes = [64, 128], strides = [1, 1]} : vector<64x384xf32> to vector<64x128xf32>
    %c60_i32_15 = arith.constant 60 : i32
    %33 = tpu.dynamic_rotate %32 by %c60_i32_15 dim 0 : vector<64x128xf32>, i32 -> vector<64x128xf32>
    %cst_16 = arith.constant 0.000000e+00 : f32
    %34 = vector.broadcast %cst_16 : f32 to vector<64x128xf32>
    %35 = arith.select %4, %33, %34 : vector<64x128xi1>, vector<64x128xf32>
    %36 = arith.addf %31, %35 : vector<64x128xf32>
    %c0_17 = arith.constant 0 : index
    %c0_18 = arith.constant 0 : index
    %37 = vector.load %arg5[%c0_17, %c0_18] : memref<1x128xf32, #tpu.memory_space<vmem>>, vector<1x128xf32>
    %38 = vector.broadcast %37 : vector<1x128xf32> to vector<64x128xf32>
    %39 = arith.addf %36, %38 : vector<64x128xf32>
    %40 = arith.addf %39, %5 : vector<64x128xf32>
    %cst_19 = arith.constant 0.000000e+00 : f32
    %41 = vector.broadcast %cst_19 : f32 to vector<64x128xf32>
    %42 = arith.maximumf %40, %41 : vector<64x128xf32>
    %c0_20 = arith.constant 0 : index
    %c0_21 = arith.constant 0 : index
    %43 = vector.load %arg6[%c0_20, %c0_21] : memref<64x128xf32, #tpu.memory_space<vmem>>, vector<64x128xf32>
    tpu.vector_store %arg6[%c0_20, %c0_21], %42 {strides = array<i32>} : memref<64x128xf32, #tpu.memory_space<vmem>>, vector<64x128xf32>,
    return
  }
  func.func @transform_0(%arg0: i32) -> (i32, i32) {
    %c0_i32 = arith.constant 0 : i32
    %c0_i32_0 = arith.constant 0 : i32
    return %arg0, %c0_i32 : i32, i32
  }
  func.func @transform_1(%arg0: i32) -> (i32, i32) {
    %c0_i32 = arith.constant 0 : i32
    %c0_i32_0 = arith.constant 0 : i32
    %c0_i32_1 = arith.constant 0 : i32
    return %c0_i32, %c0_i32_0 : i32, i32
  }
  func.func @transform_2(%arg0: i32) -> (i32, i32) {
    %c0_i32 = arith.constant 0 : i32
    %c0_i32_0 = arith.constant 0 : i32
    %c0_i32_1 = arith.constant 0 : i32
    return %c0_i32, %c0_i32_0 : i32, i32
  }
  func.func @transform_3(%arg0: i32) -> (i32, i32) {
    %c0_i32 = arith.constant 0 : i32
    %c0_i32_0 = arith.constant 0 : i32
    %c0_i32_1 = arith.constant 0 : i32
    return %c0_i32, %c0_i32_0 : i32, i32
  }
  func.func @transform_4(%arg0: i32) -> (i32, i32) {
    %c0_i32 = arith.constant 0 : i32
    %c0_i32_0 = arith.constant 0 : i32
    %c0_i32_1 = arith.constant 0 : i32
    return %c0_i32, %c0_i32_0 : i32, i32
  }
  func.func @transform_5(%arg0: i32) -> (i32, i32) {
    %c0_i32 = arith.constant 0 : i32
    %c0_i32_0 = arith.constant 0 : i32
    return %arg0, %c0_i32 : i32, i32
  }
}

</mosaic_0001>

<bundles_post_ra>
// kernel: l1block_pallas.1
= control target key start
LH: loop header
LB: loop body
LE: loop exit
PB: predicated region body
PF: predicated region fallthrough
CT: control target
= control target key end

     0   :  { %s1365_s18 = smov 0   ;;  %s1881_s0 = inlined_call_operand.vmem [shape: f32[128,128], index: 0, kind: input, shape index: {}]   ;;  %s1882_s1 = inlined_call_operand.vmem [shape: f32[128,384], index: 1, kind: input, shape index: {}]   ;;  %s1883_s2 = inlined_call_operand.vmem [shape: f32[1,128], index: 2, kind: input, shape index: {}]   ;;  %s1884_s3 = inlined_call_operand.vmem [shape: f32[128,384], index: 3, kind: input, shape index: {}]   ;;  %s1885_s4 = inlined_call_operand.vmem [shape: f32[1,128], index: 4, kind: input, shape index: {}]   ;;  %s1886_s5 = inlined_call_operand.vmem [shape: f32[128,128], index: 5, kind: output, shape index: {}]  }
   0x1 LB: > { %s1040_s19 = sadd.s32 4294967295, %s1332_s18   ;;  %p1044_p0 = scmp.ge.s32.totalorder %s1332_s18, 1  ;;  %s1332_s18 = sphi %s1365_s18, %s15_s18  }
   0x2   : > { %p188_p1 = scmp.lt.s32.totalorder %s1332_s18, 3 }
   0x4   : > { %p189_p2 = pnand %p1044_p0, %p188_p1 }
   0x5   : > { %v262_v0 = vld [vmem:[%s1882_s1 + $0x8] sm:$0xff] (!%p189_p2)  ;;  %v265_v1 = vld [vmem:[%s1882_s1 + $0x20] sm:$0xff] (!%p189_p2)  ;;  %s1382_s26 = sshll.u32 (!%p189_p2), %s1040_s19, 3  ;;  %v264_v4 = vld [vmem:[%s1882_s1 + $0x18] sm:$0xff] (!%p189_p2)  ;;  %v1334_v7 = vmov (!%p189_p2), 0.0  }
   0x6   : > { %192 = sbr.rel (%p189_p2) target bundleno = 547 (0x223), region = 40  ;;  %v261_v2 = vld [vmem:[%s1882_s1] sm:$0xff] (!%p189_p2)  ;;  %v1189_v3 = vpack.c.bf16 (!%p189_p2), %v265_v1, %v262_v0  ;;  %v263_v5 = vld [vmem:[%s1882_s1 + $0x10] sm:$0xff] (!%p189_p2)  ;;  %v266_v6 = vld [vmem:[%s1882_s1 + $0x28] sm:$0xff] (!%p189_p2)  ;;  %373 = vmatprep.mubr.f32.mxu0 (!%p189_p2), %v1334_v7  ;;  %p217_p3 = scmp.lt.s32.totalorder (!%p189_p2), %s1382_s26, 15 }
   0x7   : > { %v1191_v8 = vpack.c.bf16 (!%p189_p2), %v264_v4, %v261_v2  ;;  %v1221_v9 = vpack.c.bf16 (!%p189_p2), %v266_v6, %v263_v5  ;;  %v268_v10 = vld [vmem:[%s1882_s1 + $0x38] sm:$0xff] (!%p189_p2)  ;;  %v271_v11 = vld [vmem:[%s1882_s1 + $0x50] sm:$0xff] (!%p189_p2)  ;;  %v270_v14 = vld [vmem:[%s1882_s1 + $0x48] sm:$0xff] (!%p189_p2) }
   0x8   : > { %v267_v12 = vld [vmem:[%s1882_s1 + $0x30] sm:$0xff] (!%p189_p2)  ;;  %1190 = vmatprep.subr.bf16.mxu0 (!%p189_p2), %v1189_v3  ;;  %v1193_v13 = vpack.c.bf16 (!%p189_p2), %v271_v11, %v268_v10  ;;  %v269_v15 = vld [vmem:[%s1882_s1 + $0x40] sm:$0xff] (!%p189_p2)  ;;  %v272_v16 = vld [vmem:[%s1882_s1 + $0x58] sm:$0xff] (!%p189_p2) }
   0x9   : > { %1192 = vmatpush1.bf16.msra.mxu0 (!%p189_p2), %v1191_v8  ;;  %1222 = vmatprep.subr.bf16.mxu1 (!%p189_p2), %v1221_v9  ;;  %v1195_v17 = vpack.c.bf16 (!%p189_p2), %v270_v14, %v267_v12  ;;  %v1225_v18 = vpack.c.bf16 (!%p189_p2), %v272_v16, %v269_v15  ;;  %v274_v19 = vld [vmem:[%s1882_s1 + $0x68] sm:$0xff] (!%p189_p2)  ;;  %v277_v20 = vld [vmem:[%s1882_s1 + $0x80] sm:$0xff] (!%p189_p2)  ;;  %v276_v23 = vld [vmem:[%s1882_s1 + $0x78] sm:$0xff] (!%p189_p2) }
   0xa   : > { %v273_v21 = vld [vmem:[%s1882_s1 + $0x60] sm:$0xff] (!%p189_p2)  ;;  %1224 = vmatpush3.bf16.msra.mxu1 (!%p189_p2), %v1221_v9  ;;  %1194 = vmatprep.subr.bf16.mxu0 (!%p189_p2), %v1193_v13  ;;  %v1197_v22 = vpack.c.bf16 (!%p189_p2), %v277_v20, %v274_v19  ;;  %v275_v24 = vld [vmem:[%s1882_s1 + $0x70] sm:$0xff] (!%p189_p2)  ;;  %v278_v25 = vld [vmem:[%s1882_s1 + $0x88] sm:$0xff] (!%p189_p2) }
   0xb   : > { %1226 = vmatprep.subr.bf16.mxu1 (!%p189_p2), %v1225_v18  ;;  %v1229_v26 = vpack.c.bf16 (!%p189_p2), %v278_v25, %v275_v24  ;;  %v280_v27 = vld [vmem:[%s1882_s1 + $0x98] sm:$0xff] (!%p189_p2)  ;;  %v283_v28 = vld [vmem:[%s1882_s1 + $0xb0] sm:$0xff] (!%p189_p2)  ;;  %v281_v29 = vld [vmem:[%s1882_s1 + $0xa0] sm:$0xff] (!%p189_p2)  ;;  %v1199_v31 = vpack.c.bf16 (!%p189_p2), %v276_v23, %v273_v21 }
   0xc   : > { %v284_v30 = vld [vmem:[%s1882_s1 + $0xb8] sm:$0xff] (!%p189_p2)  ;;  %v1201_v32 = vpack.c.bf16 (!%p189_p2), %v283_v28, %v280_v27  ;;  %v279_v33 = vld [vmem:[%s1882_s1 + $0x90] sm:$0xff] (!%p189_p2)  ;;  %v282_v34 = vld [vmem:[%s1882_s1 + $0xa8] sm:$0xff] (!%p189_p2) }
   0xd   : > { %s1888_s26 = smov (!%p217_p3, %s1382_s26), 15  ;;  %1196 = vmatpush1.bf16.msra.mxu0 %v1195_v17  ;;  %v1233_v35 = vpack.c.bf16 %v284_v30, %v281_v29  ;;  %v286_v36 = vld [vmem:[%s1882_s1 + $0xc8] sm:$0xff]  ;;  %v289_v37 = vld [vmem:[%s1882_s1 + $0xe0] sm:$0xff]  ;;  %v287_v38 = vld [vmem:[%s1882_s1 + $0xd0] sm:$0xff]  ;;  %v1203_v40 = vpack.c.bf16 %v282_v34, %v279_v33 }
   0xe   : > { %1228 = vmatpush3.bf16.msra.mxu1 %v1225_v18  ;;  %1198 = vmatprep.subr.bf16.mxu0 %v1197_v22  ;;  %s1046_s27 = sshll.u32 %s1888_s26, 3  ;;  %v290_v39 = vld [vmem:[%s1882_s1 + $0xe8] sm:$0xff]  ;;  %v1205_v41 = vpack.c.bf16 %v289_v37, %v286_v36  ;;  %v285_v42 = vld [vmem:[%s1882_s1 + $0xc0] sm:$0xff]  ;;  %v288_v43 = vld [vmem:[%s1882_s1 + $0xd8] sm:$0xff] }
   0xf   : > { %1230 = vmatprep.subr.bf16.mxu1 %v1229_v26  ;;  %s1478_s13 = scalar_lea.vmem %s1881_s0, %s1046_s27  ;;  %v1237_v44 = vpack.c.bf16 %v290_v39, %v287_v38  ;;  %v292_v45 = vld [vmem:[%s1882_s1 + $0xf8] sm:$0xff]  ;;  %v295_v46 = vld [vmem:[%s1882_s1 + $0x110] sm:$0xff]  ;;  %v293_v47 = vld [vmem:[%s1882_s1 + $0x100] sm:$0xff]  ;;  %v1207_v49 = vpack.c.bf16 %v288_v43, %v285_v42  ;;  %s1828_s22 = scalar_lea.vmem %s1886_s5, %s1046_s27 }
  0x10   : > { %v296_v48 = vld [vmem:[%s1882_s1 + $0x118] sm:$0xff]  ;;  %v1493_v50 = vld [vmem:[%s1478_s13] sm:$0xff]  ;;  %v1209_v51 = vpack.c.bf16 %v295_v46, %v292_v45  ;;  %v291_v52 = vld [vmem:[%s1882_s1 + $0xf0] sm:$0xff] }
  0x11   : > { %1200 = vmatpush1.bf16.msra.mxu0 %v1199_v31  ;;  %v294_v53 = vld [vmem:[%s1882_s1 + $0x108] sm:$0xff]  ;;  %v1241_v54 = vpack.c.bf16 %v296_v48, %v293_v47  ;;  %v301_v56 = vld [vmem:[%s1882_s1 + $0x140] sm:$0xff]  ;;  %1133 = vmatprep.mubr.f32.mxu1 %v1493_v50  ;;  %v299_v57 = vld [vmem:[%s1882_s1 + $0x130] sm:$0xff] }
  0x12   : > { %1232 = vmatpush3.bf16.msra.mxu1 %v1229_v26  ;;  %1202 = vmatprep.subr.bf16.mxu0 %v1201_v32  ;;  %v298_v55 = vld [vmem:[%s1882_s1 + $0x128] sm:$0xff]  ;;  %v1211_v59 = vpack.c.bf16 %v294_v53, %v291_v52  ;;  %v297_v61 = vld [vmem:[%s1882_s1 + $0x120] sm:$0xff]  ;;  %v300_v62 = vld [vmem:[%s1882_s1 + $0x138] sm:$0xff] }
  0x13   : > { %1234 = vmatprep.subr.bf16.mxu1 %v1233_v35  ;;  %v302_v58 = vld [vmem:[%s1882_s1 + $0x148] sm:$0xff]  ;;  %v1213_v60 = vpack.c.bf16 %v301_v56, %v298_v55  ;;  %v304_v0 = vld [vmem:[%s1882_s1 + $0x158] sm:$0xff]  ;;  %v307_v1 = vld [vmem:[%s1882_s1 + $0x170] sm:$0xff]  ;;  %v1215_v4 = vpack.c.bf16 %v300_v62, %v297_v61 }
  0x14   : > { %v1245_v63 = vpack.c.bf16 %v302_v58, %v299_v57  ;;  %v305_v2 = vld [vmem:[%s1882_s1 + $0x160] sm:$0xff]  ;;  %v308_v3 = vld [vmem:[%s1882_s1 + $0x178] sm:$0xff]  ;;  %v1217_v5 = vpack.c.bf16 %v307_v1, %v304_v0  ;;  %v303_v6 = vld [vmem:[%s1882_s1 + $0x150] sm:$0xff] }
  0x15   : > { %1204 = vmatpush1.bf16.msra.mxu0 %v1203_v40  ;;  %v306_v8 = vld [vmem:[%s1882_s1 + $0x168] sm:$0xff]  ;;  %v1249_v9 = vpack.c.bf16 %v308_v3, %v305_v2  ;;  %v1542_v12 = vld [vmem:[%s1478_s13 + $0x10] sm:$0xff]  ;;  %v1549_v13 = vld [vmem:[%s1478_s13 + $0x18] sm:$0xff] }
  0x16   : > { %1236 = vmatpush3.bf16.msra.mxu1 %v1233_v35  ;;  %1206 = vmatprep.subr.bf16.mxu0 %v1205_v41  ;;  %v1219_v10 = vpack.c.bf16 %v306_v8, %v303_v6  ;;  %v1539_v11 = vld [vmem:[%s1478_s13 + $0x8] sm:$0xff]  ;;  %v1552_v14 = vld [vmem:[%s1478_s13 + $0x20] sm:$0xff]  ;;  %v1562_v16 = vld [vmem:[%s1478_s13 + $0x30] sm:$0xff] }
  0x17   : > { %1238 = vmatprep.subr.bf16.mxu1 %v1237_v44  ;;  %v1559_v15 = vld [vmem:[%s1478_s13 + $0x28] sm:$0xff]  ;;  %v1569_v17 = vld [vmem:[%s1478_s13 + $0x38] sm:$0xff]  ;;  %v619_v19 = vld [vmem:[%s1884_s3 + $0x20] sm:$0xff] }
  0x18   : > { %v616_v18 = vld [vmem:[%s1884_s3 + $0x8] sm:$0xff]  ;;  %v615_v21 = vld [vmem:[%s1884_s3] sm:$0xff]  ;;  %v618_v22 = vld [vmem:[%s1884_s3 + $0x18] sm:$0xff] }
  0x19   : > { %1208 = vmatpush1.bf16.msra.mxu0 %v1207_v49  ;;  %v1253_v20 = vpack.c.bf16 %v619_v19, %v616_v18  ;;  %v617_v23 = vld [vmem:[%s1884_s3 + $0x10] sm:$0xff]  ;;  %v1255_v24 = vpack.c.bf16 %v618_v22, %v615_v21  ;;  %v620_v25 = vld [vmem:[%s1884_s3 + $0x28] sm:$0xff]  ;;  %v622_v27 = vld [vmem:[%s1884_s3 + $0x38] sm:$0xff] }
  0x1a   : > { %1240 = vmatpush3.bf16.msra.mxu1 %v1237_v44  ;;  %1210 = vmatprep.subr.bf16.mxu0 %v1209_v51  ;;  %v1285_v26 = vpack.c.bf16 %v620_v25, %v617_v23  ;;  %v625_v28 = vld [vmem:[%s1884_s3 + $0x50] sm:$0xff]  ;;  %v624_v31 = vld [vmem:[%s1884_s3 + $0x48] sm:$0xff]  ;;  %v623_v32 = vld [vmem:[%s1884_s3 + $0x40] sm:$0xff] }
  0x1b   : > { %1242 = vmatprep.subr.bf16.mxu1 %v1241_v54  ;;  %v1257_v29 = vpack.c.bf16 %v625_v28, %v622_v27  ;;  %v621_v30 = vld [vmem:[%s1884_s3 + $0x30] sm:$0xff]  ;;  %v626_v34 = vld [vmem:[%s1884_s3 + $0x58] sm:$0xff]  ;;  %v628_v36 = vld [vmem:[%s1884_s3 + $0x68] sm:$0xff] }
  0x1c   : > { %v1259_v33 = vpack.c.bf16 %v624_v31, %v621_v30  ;;  %v1289_v35 = vpack.c.bf16 %v626_v34, %v623_v32  ;;  %v631_v37 = vld [vmem:[%s1884_s3 + $0x80] sm:$0xff]  ;;  %v630_v40 = vld [vmem:[%s1884_s3 + $0x78] sm:$0xff]  ;;  %v629_v41 = vld [vmem:[%s1884_s3 + $0x70] sm:$0xff] }
  0x1d   : > { %1212 = vmatpush1.bf16.msra.mxu0 %v1211_v59  ;;  %v1261_v38 = vpack.c.bf16 %v631_v37, %v628_v36  ;;  %v627_v39 = vld [vmem:[%s1884_s3 + $0x60] sm:$0xff]  ;;  %v632_v43 = vld [vmem:[%s1884_s3 + $0x88] sm:$0xff]  ;;  %v634_v45 = vld [vmem:[%s1884_s3 + $0x98] sm:$0xff] }
  0x1e   : > { %1244 = vmatpush3.bf16.msra.mxu1 %v1241_v54  ;;  %1214 = vmatprep.subr.bf16.mxu0 %v1213_v60  ;;  %v1263_v42 = vpack.c.bf16 %v630_v40, %v627_v39  ;;  %v1293_v44 = vpack.c.bf16 %v632_v43, %v629_v41  ;;  %v637_v46 = vld [vmem:[%s1884_s3 + $0xb0] sm:$0xff]  ;;  %v636_v49 = vld [vmem:[%s1884_s3 + $0xa8] sm:$0xff]  ;;  %v635_v51 = vld [vmem:[%s1884_s3 + $0xa0] sm:$0xff] }
  0x1f   : > { %1246 = vmatprep.subr.bf16.mxu1 %v1245_v63  ;;  %v1265_v47 = vpack.c.bf16 %v637_v46, %v634_v45  ;;  %v633_v48 = vld [vmem:[%s1884_s3 + $0x90] sm:$0xff]  ;;  %v638_v53 = vld [vmem:[%s1884_s3 + $0xb8] sm:$0xff]  ;;  %v640_v55 = vld [vmem:[%s1884_s3 + $0xc8] sm:$0xff] }
  0x20   : > { %v1267_v52 = vpack.c.bf16 %v636_v49, %v633_v48  ;;  %v1297_v54 = vpack.c.bf16 %v638_v53, %v635_v51  ;;  %v643_v56 = vld [vmem:[%s1884_s3 + $0xe0] sm:$0xff]  ;;  %v642_v59 = vld [vmem:[%s1884_s3 + $0xd8] sm:$0xff]  ;;  %v641_v60 = vld [vmem:[%s1884_s3 + $0xd0] sm:$0xff] }
  0x21   : > { %1216 = vmatpush1.bf16.msra.mxu0 %v1215_v4  ;;  %v1269_v57 = vpack.c.bf16 %v643_v56, %v640_v55  ;;  %v639_v58 = vld [vmem:[%s1884_s3 + $0xc0] sm:$0xff]  ;;  %v644_v62 = vld [vmem:[%s1884_s3 + $0xe8] sm:$0xff]  ;;  %v646_v0 = vld [vmem:[%s1884_s3 + $0xf8] sm:$0xff] }
  0x22   : > { %1248 = vmatpush3.bf16.msra.mxu1 %v1245_v63  ;;  %1218 = vmatprep.subr.bf16.mxu0 %v1217_v5  ;;  %v1271_v61 = vpack.c.bf16 %v642_v59, %v639_v58  ;;  %v1301_v63 = vpack.c.bf16 %v644_v62, %v641_v60  ;;  %v649_v1 = vld [vmem:[%s1884_s3 + $0x110] sm:$0xff]  ;;  %v648_v4 = vld [vmem:[%s1884_s3 + $0x108] sm:$0xff]  ;;  %v647_v5 = vld [vmem:[%s1884_s3 + $0x100] sm:$0xff] }
  0x23   : > { %1250 = vmatprep.subr.bf16.mxu1 %v1249_v9  ;;  %v1273_v2 = vpack.c.bf16 %v649_v1, %v646_v0  ;;  %v645_v3 = vld [vmem:[%s1884_s3 + $0xf0] sm:$0xff]  ;;  %v650_v8 = vld [vmem:[%s1884_s3 + $0x118] sm:$0xff]  ;;  %v655_v18 = vld [vmem:[%s1884_s3 + $0x140] sm:$0xff] }
  0x24   : > { %v1275_v6 = vpack.c.bf16 %v648_v4, %v645_v3  ;;  %v654_v21 = vld [vmem:[%s1884_s3 + $0x138] sm:$0xff]  ;;  %v653_v22 = vld [vmem:[%s1884_s3 + $0x130] sm:$0xff]  ;;  %v660_v30 = vld [vmem:[%s1884_s3 + $0x168] sm:$0xff] }
  0x25   : > { %1220 = vmatpush1.bf16.msra.mxu0 %v1219_v10  ;;  %v652_v10 = vld [vmem:[%s1884_s3 + $0x128] sm:$0xff]  ;;  %v661_v27 = vld [vmem:[%s1884_s3 + $0x170] sm:$0xff]  ;;  %v659_v31 = vld [vmem:[%s1884_s3 + $0x160] sm:$0xff] }
  0x26   : > { %1252 = vmatpush3.bf16.msra.mxu1 %v1249_v9  ;;  %1254 = vmatprep.subr.bf16.mxu0 %v1253_v20  ;;  %v1305_v9 = vpack.c.bf16 %v650_v8, %v647_v5  ;;  %v1277_v19 = vpack.c.bf16 %v655_v18, %v652_v10  ;;  %v651_v20 = vld [vmem:[%s1884_s3 + $0x120] sm:$0xff] }
  0x27   : > { %1286 = vmatprep.subr.bf16.mxu1 %v1285_v26  ;;  %v1279_v23 = vpack.c.bf16 %v654_v21, %v651_v20 }
  0x28   : > { %374 = vmatmul.mubr.f32.vlgmr.msra.gmra.mrb[0].mxu0 %v1493_v50 }
  0x29   : > { %1134 = vmatmul.mubr.f32.vlgmr.msra.gmra.mrb[0].mxu1 %v1539_v11  ;;  %379 = vmatprep.mubr.f32.mxu0 %v1334_v7 }
  0x2a   : > { %1136 = vmatprep.mubr.f32.mxu1 %v1542_v12  ;;  %1256 = vmatpush1.bf16.msra.mxu0 %v1255_v24  ;;  %v656_v24 = vld [vmem:[%s1884_s3 + $0x148] sm:$0xff] }
  0x2b   : > { %1288 = vmatpush3.bf16.msra.mxu1 %v1285_v26  ;;  %1258 = vmatprep.subr.bf16.mxu0 %v1257_v29  ;;  %v1309_v25 = vpack.c.bf16 %v656_v24, %v653_v22  ;;  %v658_v26 = vld [vmem:[%s1884_s3 + $0x158] sm:$0xff]  ;;  %v657_v29 = vld [vmem:[%s1884_s3 + $0x150] sm:$0xff] }
  0x2c   : > { %380 = vmatmul.mubr.f32.gmra.mrb[2].mxu0 %v1539_v11  ;;  %1290 = vmatprep.subr.bf16.mxu1 %v1289_v35  ;;  %v1281_v28 = vpack.c.bf16 %v661_v27, %v658_v26  ;;  %v1283_v32 = vpack.c.bf16 %v660_v30, %v657_v29 }
  0x2d   : > { %1137 = vmatmul.mubr.f32.gmra.mrb[2].mxu1 %v1549_v13  ;;  %385 = vmatprep.mubr.f32.mxu0 %v1334_v7 }
  0x2e   : > { %1139 = vmatprep.mubr.f32.mxu1 %v1552_v14  ;;  %1260 = vmatpush1.bf16.msra.mxu0 %v1259_v33  ;;  %v662_v33 = vld [vmem:[%s1884_s3 + $0x178] sm:$0xff] }
  0x2f   : > { %1292 = vmatpush3.bf16.msra.mxu1 %v1289_v35  ;;  %1262 = vmatprep.subr.bf16.mxu0 %v1261_v38  ;;  %v1313_v34 = vpack.c.bf16 %v662_v33, %v659_v31  ;;  %v228_v35 = vlaneseq }
  0x30   : > { %386 = vmatmul.mubr.f32.gmra.mrb[4].mxu0 %v1542_v12  ;;  %1294 = vmatprep.subr.bf16.mxu1 %v1293_v44 }
  0x31   : > { %391 = vmatprep.mubr.f32.mxu0 %v1334_v7  ;;  %1140 = vmatmul.mubr.f32.gmra.mrb[4].mxu1 %v1559_v15  ;;  %v1728_v37 = vshrl.u32 %v228_v35, 7 }
  0x32   : > { %1142 = vmatprep.mubr.f32.mxu1 %v1562_v16  ;;  %1264 = vmatpush1.bf16.msra.mxu0 %v1263_v42 }
  0x33   : > { %1296 = vmatpush3.bf16.msra.mxu1 %v1293_v44  ;;  %1266 = vmatprep.subr.bf16.mxu0 %v1265_v47  ;;  %vm535_vm0 = vcmp.lt.s32.totalorder %v1728_v37, 4  ;;  %vm237_vm2 = vcmp.ge.s32.totalorder %v1728_v37, 4 }
  0x34   : > { %392 = vmatmul.mubr.f32.gmra.mrb[6].mxu0 %v1549_v13  ;;  %1298 = vmatprep.subr.bf16.mxu1 %v1297_v54 }
  0x35   : > { %397 = vmatprep.mubr.f32.mxu0 %v1334_v7  ;;  %1143 = vmatmul.mubr.f32.gmra.mrb[6].mxu1 %v1569_v17 }
  0x36   : > { %1268 = vmatpush1.bf16.msra.mxu0 %v1267_v52 }
  0x37   : > { %1300 = vmatpush3.bf16.msra.mxu1 %v1297_v54  ;;  %1270 = vmatprep.subr.bf16.mxu0 %v1269_v57 }
  0x38   : > { %398 = vmatmul.mubr.f32.gmra.mrb[8].mxu0 %v1552_v14  ;;  %1302 = vmatprep.subr.bf16.mxu1 %v1301_v63 }
  0x39   : > { %403 = vmatprep.mubr.f32.mxu0 %v1334_v7 }
  0x3a   : > { %1272 = vmatpush1.bf16.msra.mxu0 %v1271_v61 }
  0x3b   : > { %1304 = vmatpush3.bf16.msra.mxu1 %v1301_v63  ;;  %1274 = vmatprep.subr.bf16.mxu0 %v1273_v2 }
  0x3c   : > { %404 = vmatmul.mubr.f32.gmra.mrb[10].mxu0 %v1559_v15  ;;  %1306 = vmatprep.subr.bf16.mxu1 %v1305_v9 }
  0x3d   : > { %409 = vmatprep.mubr.f32.mxu0 %v1334_v7 }
  0x3e   : > { %1276 = vmatpush1.bf16.msra.mxu0 %v1275_v6 }
  0x3f   : > { %1308 = vmatpush3.bf16.msra.mxu1 %v1305_v9  ;;  %1278 = vmatprep.subr.bf16.mxu0 %v1277_v19 }
  0x40   : > { %410 = vmatmul.mubr.f32.gmra.mrb[12].mxu0 %v1562_v16  ;;  %1310 = vmatprep.subr.bf16.mxu1 %v1309_v25 }
  0x41   : > { %415 = vmatprep.mubr.f32.mxu0 %v1334_v7 }
  0x42   : > { %1280 = vmatpush1.bf16.msra.mxu0 %v1279_v23 }
  0x43   : > { %1312 = vmatpush3.bf16.msra.mxu1 %v1309_v25  ;;  %1282 = vmatprep.subr.bf16.mxu0 %v1281_v28 }
  0x44   : > { %416 = vmatmul.mubr.f32.gmra.mrb[14].mxu0 %v1569_v17  ;;  %1314 = vmatprep.subr.bf16.mxu1 %v1313_v34 }
  0x45   : > { %727 = vmatprep.mubr.f32.mxu0 %v1334_v7 }
  0x46   : > { %1284 = vmatpush1.bf16.msra.mxu0 %v1283_v32 }
  0x47   : > { %1316 = vmatpush3.bf16.msra.mxu1 %v1313_v34 }
  0xfb   : > { %v1726_v36 = vpop.f32.mrb[0].mxu0 }
  0xfc   : > { %v1730_v38 = vpop.f32.mrb[1].mxu0  ;;  %v1135_v39 = vpop.f32.mrb[0].mxu1  ;;  %v527_v44 = vrot.slane %v1726_v36, 4 }
  0xfd   : > { %v488_v40 = vpop.f32.mrb[1].mxu1  ;;  %v561_v41 = vrot.slane %v1135_v39, 4 }
  0xfe   : > { %v560_v42 = vrot.slane %v488_v40, 4 }
  0xff   : > { %v381_v43 = vpop.f32.mrb[2].mxu0 }
 0x100   : > { %v528_v45 = vrot.slane %v381_v43, 4  ;;  %v1736_v46 = vsel %vm535_vm0, %v560_v42, %v561_v41  ;;  %v383_v47 = vpop.f32.mrb[3].mxu0  ;;  %v1138_v48 = vpop.f32.mrb[2].mxu1 }
 0x101   : > { %v563_v49 = vrot.slane %v1138_v48, 4  ;;  %v498_v51 = vpop.f32.mrb[3].mxu1 }
 0x102   : > { %v542_v52 = vsel %vm535_vm0, %v527_v44, %v528_v45  ;;  %v562_v53 = vrot.slane %v498_v51, 4 }
 0x103   : > { %v553_v54 = vadd.f32 %v542_v52, %v383_v47  ;;  %v387_v55 = vpop.f32.mrb[4].mxu0 }
 0x104   : > { %v573_v56 = vsel %vm535_vm0, %v561_v41, %v562_v53  ;;  %v529_v57 = vrot.slane %v387_v55, 4  ;;  %v389_v58 = vpop.f32.mrb[5].mxu0  ;;  %v572_v59 = vsel %vm535_vm0, %v562_v53, %v563_v49  ;;  %v1141_v60 = vpop.f32.mrb[4].mxu1 }
 0x105   : > { %v585_v61 = vadd.f32 %v573_v56, %v553_v54  ;;  %v565_v62 = vrot.slane %v1141_v60, 4  ;;  %v508_v63 = vpop.f32.mrb[5].mxu1  ;;  %v1049_v60 = vld [vmem:[%s1883_s2] ss:$0 sm:$0xff] }
 0x106   : > { %v541_v0 = vsel %vm535_vm0, %v528_v45, %v529_v57  ;;  %v564_v1 = vrot.slane %v508_v63, 4 }
 0x107   : > { %v554_v2 = vadd.f32 %v541_v0, %v389_v58  ;;  %v393_v3 = vpop.f32.mrb[6].mxu0 }
 0x108   : > { %v530_v4 = vrot.slane %v393_v3, 4  ;;  %v395_v5 = vpop.f32.mrb[7].mxu0  ;;  %v571_v6 = vsel %vm535_vm0, %v563_v49, %v564_v1  ;;  %v570_v8 = vsel %vm535_vm0, %v564_v1, %v565_v62  ;;  %v1144_v9 = vpop.f32.mrb[6].mxu1 }
 0x109   : > { %v586_v10 = vadd.f32 %v572_v59, %v554_v2  ;;  %v567_v18 = vrot.slane %v1144_v9, 4  ;;  %v518_v19 = vpop.f32.mrb[7].mxu1 }
 0x10a   : > { %v540_v20 = vsel %vm535_vm0, %v529_v57, %v530_v4  ;;  %v566_v21 = vrot.slane %v518_v19, 4 }
 0x10b   : > { %v555_v22 = vadd.f32 %v540_v20, %v395_v5  ;;  %v399_v23 = vpop.f32.mrb[8].mxu0  ;;  %v575_v24 = vsel %vm535_vm0, %v567_v18, %v560_v42  ;;  %v1765_v42 = vadd.s32 56, %v1728_v37  ;;  %v601_v1 = vadd.f32 %v1049_v60, %v586_v10 }
 0x10c   : > { %v531_v25 = vrot.slane %v399_v23, 4  ;;  %v401_v26 = vpop.f32.mrb[9].mxu0  ;;  %v569_v27 = vsel %vm535_vm0, %v565_v62, %v566_v21  ;;  %v568_v28 = vsel %vm535_vm0, %v566_v21, %v567_v18 }
 0x10d   : > { %v587_v29 = vadd.f32 %v571_v6, %v555_v22  ;;  %vm252_vm1 = vcmp.lt.s32.totalorder %v1765_v42, 60  ;;  %v609_v5 = vmax.f32 %v601_v1, 0.0 }
 0x10e   : > { %v539_v30 = vsel %vm535_vm0, %v530_v4, %v531_v25  ;;  %v583_v57 = vsel %vm252_vm1, %v575_v24, 0.0 }
 0x10f   : > { %v556_v31 = vadd.f32 %v539_v30, %v401_v26  ;;  %v405_v32 = vpop.f32.mrb[10].mxu0  ;;  %v602_v4 = vadd.f32 %v1049_v60, %v587_v29 }
 0x110   : > { %v532_v33 = vrot.slane %v405_v32, 4  ;;  %v407_v34 = vpop.f32.mrb[11].mxu0 }
 0x111   : > { %v588_v35 = vadd.f32 %v570_v8, %v556_v31  ;;  %v610_v8 = vmax.f32 %v602_v4, 0.0 }
 0x112   : > { %v538_v39 = vsel %vm535_vm0, %v531_v25, %v532_v33 }
 0x113   : > { %v557_v40 = vadd.f32 %v538_v39, %v407_v34  ;;  %v411_v41 = vpop.f32.mrb[12].mxu0  ;;  %v603_v6 = vadd.f32 %v1049_v60, %v588_v35 }
 0x114   : > { %v533_v43 = vrot.slane %v411_v41, 4  ;;  %v413_v45 = vpop.f32.mrb[13].mxu0  ;;  %v1811_v41 = vld [vmem:[%s1885_s4] ss:$0 sm:$0xff] }
 0x115   : > { %v589_v47 = vadd.f32 %v569_v27, %v557_v40 }
 0x116   : > { %v537_v48 = vsel %vm535_vm0, %v532_v33, %v533_v43 }
 0x117   : > { %v558_v49 = vadd.f32 %v537_v48, %v413_v45  ;;  %v417_v51 = vpop.f32.mrb[14].mxu0  ;;  %v604_v9 = vadd.f32 %v1049_v60, %v589_v47 }
 0x118   : > { %v534_v52 = vrot.slane %v417_v51, 4  ;;  %v419_v53 = vpop.f32.mrb[15].mxu0 }
 0x119   : > { %v590_v54 = vadd.f32 %v568_v28, %v558_v49 }
 0x11a   : > { %v543_v55 = vsel %vm535_vm0, %v534_v52, %v527_v44  ;;  %v536_v56 = vsel %vm535_vm0, %v533_v43, %v534_v52  ;;  %v600_v44 = vadd.f32 %v1049_v60, %v585_v61 }
 0x11b   : > { %v544_v58 = vsel %vm237_vm2, %v543_v55, 0.0  ;;  %v559_v59 = vadd.f32 %v536_v56, %v419_v53  ;;  %v605_v18 = vadd.f32 %v1049_v60, %v590_v54 }
 0x11c   : > { %v552_v62 = vadd.f32 %v544_v58, %v1730_v38  ;;  %v608_v3 = vmax.f32 %v600_v44, 0.0  ;;  %v611_v38 = vmax.f32 %v603_v6, 0.0 }
 0x11d   : > { %v591_v36 = vadd.f32 %v583_v57, %v559_v59  ;;  %v613_v10 = vmax.f32 %v605_v18, 0.0 }
 0x11e   : > { %v584_v63 = vadd.f32 %v1736_v46, %v552_v62  ;;  %v612_v46 = vmax.f32 %v604_v9, 0.0 }
 0x11f   : > { %v606_v61 = vadd.f32 %v1049_v60, %v591_v36 }
 0x120   : > { %v599_v0 = vadd.f32 %v1049_v60, %v584_v63 }
 0x121   : > { %v614_v19 = vmax.f32 %v606_v61, 0.0 }
 0x122   : > { %v607_v2 = vmax.f32 %v599_v0, 0.0 }
 0x124   : > { %728 = vmatmul.mubr.f32.vlgmr.msra.gmra.mrb[16].mxu0 %v607_v2  ;;  %1177 = vmatprep.mubr.f32.mxu1 %v607_v2 }
 0x125   : > { %1178 = vmatmul.mubr.f32.vlgmr.msra.gmra.mrb[8].mxu1 %v608_v3  ;;  %733 = vmatprep.mubr.f32.mxu0 %v1334_v7 }
 0x126   : > { %1180 = vmatprep.mubr.f32.mxu1 %v609_v5 }
 0x128   : > { %734 = vmatmul.mubr.f32.gmra.mrb[18].mxu0 %v608_v3 }
 0x129   : > { %1181 = vmatmul.mubr.f32.gmra.mrb[10].mxu1 %v610_v8  ;;  %739 = vmatprep.mubr.f32.mxu0 %v1334_v7 }
 0x12a   : > { %1183 = vmatprep.mubr.f32.mxu1 %v611_v38 }
 0x12c   : > { %740 = vmatmul.mubr.f32.gmra.mrb[20].mxu0 %v609_v5 }
 0x12d   : > { %1184 = vmatmul.mubr.f32.gmra.mrb[12].mxu1 %v612_v46  ;;  %745 = vmatprep.mubr.f32.mxu0 %v1334_v7 }
 0x12e   : > { %1186 = vmatprep.mubr.f32.mxu1 %v613_v10 }
 0x130   : > { %746 = vmatmul.mubr.f32.gmra.mrb[22].mxu0 %v610_v8 }
 0x131   : > { %1187 = vmatmul.mubr.f32.gmra.mrb[14].mxu1 %v614_v19  ;;  %751 = vmatprep.mubr.f32.mxu0 %v1334_v7 }
 0x134   : > { %752 = vmatmul.mubr.f32.gmra.mrb[24].mxu0 %v611_v38 }
 0x135   : > { %757 = vmatprep.mubr.f32.mxu0 %v1334_v7 }
 0x138   : > { %758 = vmatmul.mubr.f32.gmra.mrb[26].mxu0 %v612_v46 }
 0x139   : > { %763 = vmatprep.mubr.f32.mxu0 %v1334_v7 }
 0x13c   : > { %764 = vmatmul.mubr.f32.gmra.mrb[28].mxu0 %v613_v10 }
 0x13d   : > { %769 = vmatprep.mubr.f32.mxu0 %v1334_v7 }
 0x140   : > { %770 = vmatmul.mubr.f32.gmra.mrb[30].mxu0 %v614_v19 }
 0x1f7   : > { %v1793_v20 = vpop.f32.mrb[16].mxu0 }
 0x1f8   : > { %v1795_v21 = vpop.f32.mrb[17].mxu0  ;;  %v1179_v22 = vpop.f32.mrb[8].mxu1  ;;  %v881_v27 = vrot.slane %v1793_v20, 4 }
 0x1f9   : > { %v914_v23 = vrot.slane %v1179_v22, 4  ;;  %v842_v24 = vpop.f32.mrb[9].mxu1 }
 0x1fa   : > { %v913_v25 = vrot.slane %v842_v24, 4 }
 0x1fb   : > { %v735_v26 = vpop.f32.mrb[18].mxu0 }
 0x1fc   : > { %v1800_v28 = vsel %vm535_vm0, %v913_v25, %v914_v23  ;;  %v882_v29 = vrot.slane %v735_v26, 4  ;;  %v737_v30 = vpop.f32.mrb[19].mxu0  ;;  %v1182_v31 = vpop.f32.mrb[10].mxu1 }
 0x1fd   : > { %v916_v7 = vrot.slane %v1182_v31, 4  ;;  %v852_v32 = vpop.f32.mrb[11].mxu1 }
 0x1fe   : > { %v895_v33 = vsel %vm535_vm0, %v881_v27, %v882_v29  ;;  %v915_v34 = vrot.slane %v852_v32, 4 }
 0x1ff   : > { %v906_v35 = vadd.f32 %v895_v33, %v737_v30  ;;  %v741_v39 = vpop.f32.mrb[20].mxu0 }
 0x200   : > { %v926_v40 = vsel %vm535_vm0, %v914_v23, %v915_v34  ;;  %v883_v43 = vrot.slane %v741_v39, 4  ;;  %v743_v45 = vpop.f32.mrb[21].mxu0  ;;  %v925_v47 = vsel %vm535_vm0, %v915_v34, %v916_v7  ;;  %v1185_v48 = vpop.f32.mrb[12].mxu1 }
 0x201   : > { %v938_v49 = vadd.f32 %v926_v40, %v906_v35  ;;  %v918_v51 = vrot.slane %v1185_v48, 4  ;;  %v862_v52 = vpop.f32.mrb[13].mxu1 }
 0x202   : > { %v894_v53 = vsel %vm535_vm0, %v882_v29, %v883_v43  ;;  %v917_v54 = vrot.slane %v862_v52, 4 }
 0x203   : > { %v953_v55 = vadd.f32 %v1811_v41, %v938_v49  ;;  %v907_v56 = vadd.f32 %v894_v53, %v743_v45  ;;  %v747_v57 = vpop.f32.mrb[22].mxu0 }
 0x204   : > { %v884_v58 = vrot.slane %v747_v57, 4  ;;  %v749_v59 = vpop.f32.mrb[23].mxu0  ;;  %v924_v60 = vsel %vm535_vm0, %v916_v7, %v917_v54  ;;  %v1188_v62 = vpop.f32.mrb[14].mxu1  ;;  %v923_v36 = vsel %vm535_vm0, %v917_v54, %v918_v51 }
 0x205   : > { %v961_v63 = vadd.f32 %v953_v55, %v1539_v11  ;;  %v939_v44 = vadd.f32 %v925_v47, %v907_v56  ;;  %v920_v0 = vrot.slane %v1188_v62, 4  ;;  %v872_v1 = vpop.f32.mrb[15].mxu1 }
 0x206   : > { %v893_v2 = vsel %vm535_vm0, %v883_v43, %v884_v58  ;;  %v919_v3 = vrot.slane %v872_v1, 4 }
 0x207   : > { %v969_v4 = vmax.f32 %v961_v63, 0.0  ;;  %v954_v5 = vadd.f32 %v1811_v41, %v939_v44  ;;  %v908_v6 = vadd.f32 %v893_v2, %v749_v59  ;;  %v753_v8 = vpop.f32.mrb[24].mxu0  ;;  %v928_v11 = vsel %vm535_vm0, %v920_v0, %v913_v25 }
 0x208   : > { %v885_v9 = vrot.slane %v753_v8, 4  ;;  %v755_v38 = vpop.f32.mrb[25].mxu0  ;;  %v922_v18 = vsel %vm535_vm0, %v918_v51, %v919_v3  ;;  %v921_v46 = vsel %vm535_vm0, %v919_v3, %v920_v0  ;;  %v936_v20 = vsel %vm252_vm1, %v928_v11, 0.0 }
 0x209   : > { %977 = vst [vmem:[%s1828_s22 + $0x8] sm:$0xff] %v969_v4  ;;  %v962_v61 = vadd.f32 %v954_v5, %v1542_v12  ;;  %v940_v10 = vadd.f32 %v924_v60, %v908_v6 }
 0x20a   : > { %v892_v19 = vsel %vm535_vm0, %v884_v58, %v885_v9 }
 0x20b   : > { %v970_v22 = vmax.f32 %v962_v61, 0.0  ;;  %v955_v23 = vadd.f32 %v1811_v41, %v940_v10  ;;  %v909_v24 = vadd.f32 %v892_v19, %v755_v38  ;;  %v759_v25 = vpop.f32.mrb[26].mxu0 }
 0x20c   : > { %v886_v26 = vrot.slane %v759_v25, 4  ;;  %v761_v29 = vpop.f32.mrb[27].mxu0 }
 0x20d   : > { %978 = vst [vmem:[%s1828_s22 + $0x10] sm:$0xff] %v970_v22  ;;  %v963_v30 = vadd.f32 %v955_v23, %v1549_v13  ;;  %v941_v31 = vadd.f32 %v923_v36, %v909_v24 }
 0x20e   : > { %v891_v7 = vsel %vm535_vm0, %v885_v9, %v886_v26 }
 0x20f   : > { %v971_v12 = vmax.f32 %v963_v30, 0.0  ;;  %v956_v32 = vadd.f32 %v1811_v41, %v941_v31  ;;  %v910_v33 = vadd.f32 %v891_v7, %v761_v29  ;;  %v765_v34 = vpop.f32.mrb[28].mxu0 }
 0x210   : > { %v887_v35 = vrot.slane %v765_v34, 4  ;;  %v767_v39 = vpop.f32.mrb[29].mxu0 }
 0x211   : > { %979 = vst [vmem:[%s1828_s22 + $0x18] sm:$0xff] %v971_v12  ;;  %v964_v40 = vadd.f32 %v956_v32, %v1552_v14  ;;  %v942_v43 = vadd.f32 %v922_v18, %v910_v33 }
 0x212   : > { %v890_v45 = vsel %vm535_vm0, %v886_v26, %v887_v35 }
 0x213   : > { %v972_v13 = vmax.f32 %v964_v40, 0.0  ;;  %v957_v47 = vadd.f32 %v1811_v41, %v942_v43  ;;  %v911_v48 = vadd.f32 %v890_v45, %v767_v39  ;;  %v771_v49 = vpop.f32.mrb[30].mxu0 }
 0x214   : > { %v888_v51 = vrot.slane %v771_v49, 4  ;;  %v773_v52 = vpop.f32.mrb[31].mxu0 }
 0x215   : > { %980 = vst [vmem:[%s1828_s22 + $0x20] sm:$0xff] %v972_v13  ;;  %v965_v53 = vadd.f32 %v957_v47, %v1559_v15  ;;  %v943_v54 = vadd.f32 %v921_v46, %v911_v48 }
 0x216   : > { %v896_v14 = vsel %vm535_vm0, %v888_v51, %v881_v27  ;;  %v889_v55 = vsel %vm535_vm0, %v887_v35, %v888_v51 }
 0x217   : > { %v973_v56 = vmax.f32 %v965_v53, 0.0  ;;  %v958_v57 = vadd.f32 %v1811_v41, %v943_v54  ;;  %v897_v58 = vsel %vm237_vm2, %v896_v14, 0.0  ;;  %v912_v59 = vadd.f32 %v889_v55, %v773_v52 }
 0x218   : > { %v905_v15 = vadd.f32 %v897_v58, %v1795_v21 }
 0x219   : > { %981 = vst [vmem:[%s1828_s22 + $0x28] sm:$0xff] %v973_v56  ;;  %v966_v27 = vadd.f32 %v958_v57, %v1562_v16  ;;  %v944_v60 = vadd.f32 %v936_v20, %v912_v59 }
 0x21a   : > { %v937_v62 = vadd.f32 %v1800_v28, %v905_v15 }
 0x21b   : > { %v974_v36 = vmax.f32 %v966_v27, 0.0  ;;  %v959_v63 = vadd.f32 %v1811_v41, %v944_v60 }
 0x21c   : > { %v952_v37 = vadd.f32 %v1811_v41, %v937_v62 }
 0x21d   : > { %982 = vst [vmem:[%s1828_s22 + $0x30] sm:$0xff] %v974_v36  ;;  %v967_v44 = vadd.f32 %v959_v63, %v1569_v17 }
 0x21e   : > { %v960_v0 = vadd.f32 %v952_v37, %v1493_v50 }
 0x21f   : > { %v975_v21 = vmax.f32 %v967_v44, 0.0 }
 0x220   : > { %v968_v1 = vmax.f32 %v960_v0, 0.0 }
 0x221   : > { %983 = vst [vmem:[%s1828_s22 + $0x38] sm:$0xff] %v975_v21 }
 0x222   : > { %976 = vst [vmem:[%s1828_s22] sm:$0xff] %v968_v1 }
 0x223 PF: > { %s15_s18 = sadd.s32 1, %s1332_s18  }
 0x224   : > { %p12_p4 = scmp.ge.s32.totalorder %s15_s18, 4  }
 0x226   :  { %14 = sbr.rel (!%p12_p4) target bundleno = 1 (0x1), region = 70 }

</bundles_post_ra>
